<compile_context>
chip_gen: v5e
topology: v5e:2x2
jax: 0.10.0
libtpu: 0.0.40
codegen_flags: <defaults>
</compile_context>

<pallas_src>
import functools

import jax
import jax.numpy as jnp
from jax.experimental import pallas as pl
from jax.experimental.pallas import tpu as pltpu

_K = 3   # true contraction size (xyz)
_KP = 8  # sublane-padded contraction size (rows beyond _K are zero)


# ----------------------------- kernels ------------------------------------ #

def _linear_kernel_vpu(x_ref, w_ref, b_ref, o_ref, *, tb):
    # out = x @ w + b with K == 3, fully unrolled on the VPU:
    # (tb,1)*(1,tn) broadcast FMAs; no MXU K-padding, no result-FIFO latency.
    # x_ref is the whole (B, _KP) array resident in VMEM; slice this block's rows.
    r0 = pl.multiple_of(pl.program_id(0) * tb, tb)
    x = x_ref[pl.ds(r0, tb), :]          # (tb, _KP) f32
    w = w_ref[...]                       # (_KP, tn) f32
    o_ref[...] = (
        x[:, 0:1] * w[0:1, :]
        + x[:, 1:2] * w[1:2, :]
        + x[:, 2:3] * w[2:3, :]
        + b_ref[...]
    )


def _linear_kernel_mxu(x_ref, w_ref, b_ref, o_ref, *, tb):
    # v7x path: per-TC HBM BW (~2 KB/cyc) makes 6 VPU ops/element the binding
    # slot; run the (tb,8)x(8,tn) contraction on the MXU and keep only the bias
    # add on the VPU. The padded K rows of x / w are zero, so results match.
    r0 = pl.multiple_of(pl.program_id(0) * tb, tb)
    x = x_ref[pl.ds(r0, tb), :]          # (tb, _KP)
    o_ref[...] = (
        jnp.dot(x, w_ref[...], preferred_element_type=jnp.float32) + b_ref[...]
    )


# ----------------------- hardware-aware configuration ---------------------- #

def _device_kind():
    try:
        return jax.devices()[0].device_kind.lower()
    except Exception:
        return ""


def _num_tensorcores(kind):
    # Single-TC parts: v5e ("v5 lite"/"v5e"), v6e ("v6 lite"/"v6e"), v4i.
    if not kind or "lite" in kind or "v5e" in kind or "v6e" in kind:
        return 1
    # Megacore / dual-TC parts: v3, v4, v5p, v7x.
    for tag in ("v7", "7x", "v5p", "v4", "v3"):
        if tag in kind:
            return 2
    return 1  # conservative default: don't split for cores we can't see


def _use_mxu(kind):
    # Only v7x flips the VALU path into the binding slot; v5e/v6e keep the VPU
    # formulation (hidden under HBM, avoids MXU K-padding / result-FIFO latency).
    return ("v7" in kind) or ("7x" in kind)


def _vmem_capacity_bytes():
    try:
        cap = getattr(pltpu.get_tpu_info(), "vmem_capacity_bytes", None)
        if cap:
            return int(cap)
    except Exception:
        pass
    return None


def _vmem_config():
    # Conservative defaults that are safe on every generation (v7x: 64 MiB phys).
    budget, limit = 24 * 1024 * 1024, 32 * 1024 * 1024
    cap = _vmem_capacity_bytes()
    if cap is not None and cap >= 96 * 1024 * 1024:
        # 128 MiB-VMEM parts (v5e/v6e): bigger tiles -> fewer ~0.35us grid steps
        # and fewer W/bias re-reads per B tile.
        budget, limit = 64 * 1024 * 1024, 96 * 1024 * 1024
    return budget, limit, cap


# ----------------------------- tile selection ------------------------------ #

def _round_up(v, m):
    return ((v + m - 1) // m) * m


def _vmem_bytes(B, tb, tn):
    # Padded (8,128)-tiled f32 footprints. x is resident (single whole-array
    # copy); W, bias and out tiles are double-buffered by the pipeline.
    x_res = _round_up(B, 8) * _round_up(_KP, 128) * 4
    w_tile = _round_up(_KP, 8) * _round_up(tn, 128) * 4
    b_tile = _round_up(1, 8) * _round_up(tn, 128) * 4
    o_tile = _round_up(tb, 8) * _round_up(tn, 128) * 4
    return x_res + 2 * (w_tile + b_tile + o_tile)


def _divisors_desc(n, step):
    ds = [d for d in range(n, 0, -step) if n % d == 0]
    return ds or [n]


def _pick_tiles(B, N, vmem_budget, num_cores):
    # N tiles: largest 128-multiple divisors first (lane-dense unmasked stores);
    # fall back to the full extent when N is not 128-aligned.
    n_cands = _divisors_desc(N, 128) if N % 128 == 0 else [N]
    # B tiles: multiples of 8 when possible, else the full batch.
    b_cands = _divisors_desc(B, 8) if B % 8 == 0 else [B]

    tb, tn = b_cands[-1], n_cands[-1]   # smallest tiles as a last resort
    found = False
    for cn in n_cands:                  # biggest N tile first (fewest grid steps)
        for cb in b_cands:              # then biggest B tile that fits the budget
            if _vmem_bytes(B, cb, cn) <= vmem_budget:
                tb, tn = cb, cn
                found = True
                break
        if found:
            break

    # Only split a (1,1) grid when the chip actually has >1 TensorCore
    # (v7x / megacore). Prefer splitting the B (row) axis so each core keeps a
    # full-N lane-dense output slab; halve N only if B can't be split.
    if num_cores >= 2 and B // tb == 1 and N // tn == 1:
        if len(b_cands) > 1:
            tb = b_cands[1]
        elif len(n_cands) > 1:
            tn = n_cands[1]
    return tb, tn


# ------------------------------- forward ----------------------------------- #

def mlp_noencoder_forward(x, w_pm, b_pm, num_points: int):
    """x:(B,3); w_pm:(8,3P)/b_pm:(1,3P) point-major, K zero-padded -> (B,P,3)."""
    B, K = x.shape
    N = w_pm.shape[1]
    assert K == _K and N == 3 * num_points
    assert w_pm.shape == (_KP, N) and b_pm.shape == (1, N)

    kind = _device_kind()
    num_cores = _num_tensorcores(kind)
    budget, limit, cap = _vmem_config()
    tb, tn = _pick_tiles(B, N, budget, num_cores)
    grid = (B // tb, N // tn)
    grid_b = grid[0]

    # Make sure the scoped limit covers what the chosen tiles actually need,
    # without exceeding what the chip can give (48 MiB safe floor if unknown).
    need = _vmem_bytes(B, tb, tn) + 2 * 1024 * 1024
    hard_cap = cap if cap is not None else 48 * 1024 * 1024
    limit = min(max(limit, need), max(hard_cap, limit))

    # Zero-pad the contraction dim of x (3 -> 8); tiny, outside the kernel.
    x_p = jnp.pad(x, ((0, 0), (0, _KP - _K)))

    cost = pl.CostEstimate(
        flops=2 * B * _K * N,
        transcendentals=0,
        bytes_accessed=4 * (B * _KP + grid_b * (_KP * N + N) + B * N),
    )

    kernel = _linear_kernel_mxu if _use_mxu(kind) else _linear_kernel_vpu
    kernel = functools.partial(kernel, tb=tb)

    # TODO(synk): consider pltpu.CORE_PARALLEL on the B axis for v7x once the
    # 2-TC grid layout is validated; plain "parallel" kept here for safety.
    y = pl.pallas_call(
        kernel,
        out_shape=jax.ShapeDtypeStruct((B, N), jnp.float32),
        grid_spec=pltpu.PrefetchScalarGridSpec(
            num_scalar_prefetch=0,
            grid=grid,
            in_specs=[
                # whole x resident in VMEM (tiny); kernel slices its row block
                pl.BlockSpec(memory_space=pltpu.MemorySpace.VMEM),
                pl.BlockSpec((_KP, tn), lambda i, j: (0, j)),   # point-major W cols
                pl.BlockSpec((1, tn), lambda i, j: (0, j)),     # point-major bias
            ],
            out_specs=pl.BlockSpec((tb, tn), lambda i, j: (i, j)),
        ),
        compiler_params=pltpu.CompilerParams(
            dimension_semantics=("parallel", "parallel"),
            vmem_limit_bytes=int(limit),
        ),
        cost_estimate=cost,
    )(x_p, w_pm, b_pm)

    # Point-major columns make this reshape free (no transpose / extra HBM pass).
    return y.reshape(B, num_points, 3)


# ------------------------------ parameters --------------------------------- #

def init_params(key, num_points: int):
    # nn.Linear(3, 3*P) init: U(-1/sqrt(3), +1/sqrt(3)); weight stored transposed
    # (in, out) so y = x @ w_t + b matches PyTorch's x @ W.T + b.
    in_features, out_features = _K, 3 * num_points
    kw, kb = jax.random.split(key)
    bound = 1.0 / jnp.sqrt(jnp.float32(in_features))
    w_t = jax.random.uniform(kw, (in_features, out_features), jnp.float32, -bound, bound)
    bias = jax.random.uniform(kb, (1, out_features), jnp.float32, -bound, bound)
    return w_t, bias


def prepare_params(w_t, bias, num_points: int):
    # One-time parameter re-layout (off the hot path):
    #   * column c*P + p -> column p*3 + c (point-major), so the kernel output
    #     flattens directly to (B, P, 3) row-major with no trailing transpose;
    #   * zero-pad the contraction dim 3 -> 8 (sublane-aligned K, MXU-friendly).
    P = num_points
    w_pm = w_t.reshape(_K, 3, P).transpose(0, 2, 1).reshape(_K, 3 * P)
    b_pm = bias.reshape(1, 3, P).transpose(0, 2, 1).reshape(1, 3 * P)
    w_pm = jnp.pad(w_pm, ((0, _KP - _K), (0, 0)))
    return w_pm, b_pm


if __name__ == "__main__":
    num_points = 8          # tiny synthetic size (module default is 4096)
    B = 2

    key = jax.random.PRNGKey(0)
    kx, kp = jax.random.split(key)
    x = jax.random.normal(kx, (B, _K), jnp.float32)
    w_t, bias = init_params(kp, num_points)
    w_pm, b_pm = prepare_params(w_t, bias, num_points)

    fwd = jax.jit(functools.partial(mlp_noencoder_forward, num_points=num_points))
    out = jax.block_until_ready(fwd(x, w_pm, b_pm))

    # Pure-JAX reference of the original PyTorch semantics:
    #   y = Linear(x); y.view(-1, 3, P).permute(0, 2, 1)
    ref = (x @ w_t + bias).reshape(B, 3, num_points).transpose(0, 2, 1)
    assert out.shape == (B, num_points, 3)
    assert jnp.allclose(out, ref, atol=1e-5, rtol=1e-5)

    print("KERNEL_OK")
</pallas_src>

<mosaic_0001>
module attributes {stable_mosaic.version = 11 : i64} {
  func.func @_linear_kernel_vpu(%arg0: i32, %arg1: i32, %arg2: memref<2x8xf32, #tpu.memory_space<vmem>>, %arg3: memref<8x24xf32, #tpu.memory_space<vmem>>, %arg4: memref<1x24xf32, #tpu.memory_space<vmem>>, %arg5: memref<2x24xf32, #tpu.memory_space<vmem>>) attributes {dimension_semantics = [#tpu.dimension_semantics<parallel>, #tpu.dimension_semantics<parallel>], iteration_bounds = array<i64: 1, 1>, scalar_prefetch = 0 : i64, scratch_operands = 0 : i64, tpu.core_type = #tpu.core_type<tc>, window_params = [{pipeline_mode = #tpu.pipeline_mode<synchronous>, transform_indices = @transform_0, window_bounds = array<i64: 2, 8>}, {transform_indices = @transform_1, window_bounds = array<i64: 8, 24>}, {transform_indices = @transform_2, window_bounds = array<i64: 1, 24>}, {transform_indices = @transform_3, window_bounds = array<i64: 2, 24>}]} {
    %c2_i32 = arith.constant 2 : i32
    %0 = arith.muli %arg0, %c2_i32 : i32
    %1 = tpu.assume_multiple %0, 2 : i32
    %2 = arith.index_cast %1 : i32 to index
    %c0 = arith.constant 0 : index
    %3 = vector.load %arg2[%2, %c0] : memref<2x8xf32, #tpu.memory_space<vmem>>, vector<2x8xf32>
    %c0_0 = arith.constant 0 : index
    %c0_1 = arith.constant 0 : index
    %4 = vector.load %arg3[%c0_0, %c0_1] : memref<8x24xf32, #tpu.memory_space<vmem>>, vector<8x24xf32>
    %5 = vector.extract_strided_slice %3 {offsets = [0, 0], sizes = [2, 1], strides = [1, 1]} : vector<2x8xf32> to vector<2x1xf32>
    %6 = vector.extract_strided_slice %4 {offsets = [0, 0], sizes = [1, 24], strides = [1, 1]} : vector<8x24xf32> to vector<1x24xf32>
    %7 = vector.broadcast %5 : vector<2x1xf32> to vector<2x24xf32>
    %8 = vector.broadcast %6 : vector<1x24xf32> to vector<2x24xf32>
    %9 = arith.mulf %7, %8 : vector<2x24xf32>
    %10 = vector.extract_strided_slice %3 {offsets = [0, 1], sizes = [2, 1], strides = [1, 1]} : vector<2x8xf32> to vector<2x1xf32>
    %11 = vector.extract_strided_slice %4 {offsets = [1, 0], sizes = [1, 24], strides = [1, 1]} : vector<8x24xf32> to vector<1x24xf32>
    %12 = vector.broadcast %10 : vector<2x1xf32> to vector<2x24xf32>
    %13 = vector.broadcast %11 : vector<1x24xf32> to vector<2x24xf32>
    %14 = arith.mulf %12, %13 : vector<2x24xf32>
    %15 = arith.addf %9, %14 : vector<2x24xf32>
    %16 = vector.extract_strided_slice %3 {offsets = [0, 2], sizes = [2, 1], strides = [1, 1]} : vector<2x8xf32> to vector<2x1xf32>
    %17 = vector.extract_strided_slice %4 {offsets = [2, 0], sizes = [1, 24], strides = [1, 1]} : vector<8x24xf32> to vector<1x24xf32>
    %18 = vector.broadcast %16 : vector<2x1xf32> to vector<2x24xf32>
    %19 = vector.broadcast %17 : vector<1x24xf32> to vector<2x24xf32>
    %20 = arith.mulf %18, %19 : vector<2x24xf32>
    %21 = arith.addf %15, %20 : vector<2x24xf32>
    %c0_2 = arith.constant 0 : index
    %c0_3 = arith.constant 0 : index
    %22 = vector.load %arg4[%c0_2, %c0_3] : memref<1x24xf32, #tpu.memory_space<vmem>>, vector<1x24xf32>
    %23 = vector.broadcast %22 : vector<1x24xf32> to vector<2x24xf32>
    %24 = arith.addf %21, %23 : vector<2x24xf32>
    %c0_4 = arith.constant 0 : index
    %c0_5 = arith.constant 0 : index
    %25 = vector.load %arg5[%c0_4, %c0_5] : memref<2x24xf32, #tpu.memory_space<vmem>>, vector<2x24xf32>
    tpu.vector_store %arg5[%c0_4, %c0_5], %24 {strides = array<i32>} : memref<2x24xf32, #tpu.memory_space<vmem>>, vector<2x24xf32>,
    return
  }
  func.func @transform_0(%arg0: i32, %arg1: i32) -> (i32, i32) {
    %c0_i32 = arith.constant 0 : i32
    %c0_i32_0 = arith.constant 0 : i32
    %c0_i32_1 = arith.constant 0 : i32
    return %c0_i32, %c0_i32_0 : i32, i32
  }
  func.func @transform_1(%arg0: i32, %arg1: i32) -> (i32, i32) {
    %c0_i32 = arith.constant 0 : i32
    %c0_i32_0 = arith.constant 0 : i32
    return %c0_i32, %arg1 : i32, i32
  }
  func.func @transform_2(%arg0: i32, %arg1: i32) -> (i32, i32) {
    %c0_i32 = arith.constant 0 : i32
    %c0_i32_0 = arith.constant 0 : i32
    return %c0_i32, %arg1 : i32, i32
  }
  func.func @transform_3(%arg0: i32, %arg1: i32) -> (i32, i32) {
    %c0_i32 = arith.constant 0 : i32
    return %arg0, %arg1 : i32, i32
  }
}

</mosaic_0001>

<bundles_post_ra>
// kernel: mlp_noencoder_forward.1
= control target key start
LH: loop header
LB: loop body
LE: loop exit
PB: predicated region body
PF: predicated region fallthrough
CT: control target
= control target key end

     0   :  { %8 = vsyncpa [#allocation3], 0  ;;  %s100_s15 = smov [#allocation2]   ;;  %s136_s0 = inlined_call_operand.vmem [shape: f32[2,8], index: 0, kind: input, shape index: {}]   ;;  %s137_s1 = inlined_call_operand.hbm [shape: f32[8,24], index: 1, kind: input, shape index: {}]   ;;  %s138_s2 = inlined_call_operand.vmem [shape: f32[1,24], index: 2, kind: input, shape index: {}]   ;;  %s139_s3 = inlined_call_operand.vmem [shape: f32[2,24], index: 3, kind: output, shape index: {}]  }
   0x1   :  { %s16_s14 = sshll.u32 %s137_s1, 4  ;;  %s18_s16 = sshll.u32 %s100_s15, 4  ;;  %s17_s14 = int_to_ptr.hbm [resolvable:$true] %s16_s14  ;;  %s19_s16 = int_to_ptr.vmem [resolvable:$true] %s18_s16 }
   0x2   :  { %21 = dma.hbm_to_vmem [thread:$0]  %s17_s14, 128, %s19_s16, [#allocation3]  }
   0x3   :  { %98 = dma.done.wait [#allocation3], 128  }
   0x4   :  { %99 = vsyncadd [#allocation3], 4294967168  ;;  %v101_v0 = vmov 0   ;;  %v102_v1 = vmov 2   ;;  %v30_v2 = vld [vmem:[%s136_s0] sm:$0x3] }
   0x5   :  { %69 = vset.pattern.permute.xlu0 %v101_v0  ;;  %71 = vset.pattern.permute.xlu1 %v102_v1  ;;  %v103_v3 = vmov 1   ;;  %v31_v5 = vld [vmem:[#allocation2] sm:$0xff]  ;;  %vm58_vm0 = vcmask 189440  }
   0x6   :  { %34 = vperm.xlu0 %69, %v30_v2   ;;  %47 = vperm.xlu1 %71, %v30_v2   ;;  %v37_v6 = vperm.slane %v31_v5, 0  ;;  %v43_v7 = vperm.slane %v31_v5, 1  ;;  %v50_v8 = vperm.slane %v31_v5, 2  ;;  %v73_v15 = vld [vmem:[%s138_s2] ss:$0 sm:$0xff] }
   0xe   :  { %70 = vset.pattern.permute.xlu0 %v103_v3 }
   0xf   :  { %40 = vperm.xlu0 %70, %v30_v2  }
  0x17   :  { %72 = vset.pattern.permute.xlu0 %v102_v1 }
  0x78   :  { %v35_v4 = vpop.permute.xlu0 %34  ;;  %v48_v9 = vpop.permute.xlu1 %47 }
  0x79   :  { %v38_v11 = vmul.f32 %v37_v6, %v35_v4  ;;  %v51_v13 = vmul.f32 %v50_v8, %v48_v9 }
  0x81   :  { %v41_v10 = vpop.permute.xlu0 %40 }
  0x82   :  { %v44_v12 = vmul.f32 %v43_v7, %v41_v10 }
  0x84   :  { %v45_v14 = vadd.f32 %v44_v12, %v38_v11 }
  0x86   :  { %v52_v16 = vadd.f32 %v51_v13, %v45_v14 }
  0x88   :  { %v57_v17 = vadd.f32 %v73_v15, %v52_v16 }
  0x8a   :  { %59 = vst.msk [vmem:[%s139_s3] sm:$0x3] %vm58_vm0, %v57_v17 }
  0x8b   :  { %64 = vsyncpa [#allocation3], 1 }

</bundles_post_ra>
